<compile_context>
chip_gen: v7x
topology: tpu7x:2x2x1
jax: 0.10.0
libtpu: 0.0.40
codegen_flags: <defaults>
</compile_context>

<pallas_src>
import functools

import jax
import jax.numpy as jnp
from jax.experimental import pallas as pl
from jax.experimental.pallas import tpu as pltpu


def _round_up(n, m):
    return ((n + m - 1) // m) * m


def _cdiv(a, b):
    return (a + b - 1) // b


def _ae_kernel(x_ref, we_ref, be_ref, wd_ref, bd_ref, xhat_ref, z_ref=None,
               *, latent_nonlinearity):
    """Fused encoder -> (optional nonlinearity) -> decoder for one batch tile.

    x_ref:    [TB, D]  flattened input tile
    we_ref:   [D,  L]  encoder weight (torch Linear weight transposed)
    be_ref:   [1,  L]  encoder bias
    wd_ref:   [L,  D]  decoder weight
    bd_ref:   [1,  D]  decoder bias
    xhat_ref: [TB, D]  reconstruction tile
    z_ref:    [TB, L]  latent projection tile (optional output)
    """
    x = x_ref[...]

    # Encoder: z = x @ We + be   (MXU matmul, f32 accumulation).
    z = jnp.dot(x, we_ref[...], preferred_element_type=jnp.float32) + be_ref[...]

    # Optional latent nonlinearity (nn.Sigmoid / nn.Softmax(dim=1) / nn.Tanh).
    if latent_nonlinearity == "sigmoid":
        z = jax.nn.sigmoid(z)
    elif latent_nonlinearity == "softmax":
        z_max = jnp.max(z, axis=1, keepdims=True)
        ez = jnp.exp(z - z_max)
        z = ez / jnp.sum(ez, axis=1, keepdims=True)  # exact divide: parity w/ torch
    elif latent_nonlinearity == "tanh":
        z = jnp.tanh(z)
    # None -> identity

    if z_ref is not None:
        z_ref[...] = z.astype(z_ref.dtype)

    # Decoder: x_hat = z @ Wd + bd.
    x_hat = jnp.dot(z.astype(wd_ref.dtype), wd_ref[...],
                    preferred_element_type=jnp.float32) + bd_ref[...]
    xhat_ref[...] = x_hat.astype(xhat_ref.dtype)


def _choose_batch_tile(B, D, L, in_item, out_item, block_batch, sublane):
    """Pick a batch tile: >=4 grid steps of <=512 rows, sublane-aligned,
    under a ~12 MiB conservative VMEM budget (fits v5e's 16 MiB default)."""
    def vmem_bytes(tb):
        x_tile = tb * D * in_item
        xhat_tile = tb * D * out_item
        z_tile = tb * L * out_item
        weights = (D * L + L * D) * in_item + (L + D) * 4
        # Conservative: count double buffering on everything.
        return 2 * (x_tile + xhat_tile + z_tile + weights)

    budget = 12 * 1024 * 1024
    n_steps = max(4, _cdiv(B, 512))
    tb = _round_up(_cdiv(B, n_steps), sublane)
    tb = min(tb, max(sublane, (block_batch // sublane) * sublane))
    while tb > sublane and vmem_bytes(tb) > budget:
        tb = max(sublane, _round_up(tb // 2, sublane))
    if tb >= B:
        tb = B  # single full-extent tile (legal block even if B % sublane != 0)
    return tb, vmem_bytes(tb)


def generic_autoencoder_forward(x_nchw, we, be, wd, bd,
                                latent_nonlinearity=None,
                                compute_dtype=jnp.float32,
                                block_batch=512,
                                return_latent=True):
    """Fused AE forward. Returns (x_hat, z) (or just x_hat) matching PyTorch semantics.

    x_nchw: [B, C, H, W] (NCHW like the PyTorch module)
    we: [D, L] encoder weight (transposed vs torch),  be: [L] or [1, L]
    wd: [L, D] decoder weight (transposed vs torch),  bd: [D] or [1, D]
    compute_dtype: matmul-operand dtype (f32 or bf16); accumulation is always f32.
                   bf16 operands => bf16 outputs (halves writeback HBM traffic).
    """
    B, C, H, W = x_nchw.shape
    D = C * H * W
    L = we.shape[1]

    compute_dtype = jnp.dtype(compute_dtype)
    is_bf16 = compute_dtype == jnp.dtype(jnp.bfloat16)
    out_dtype = jnp.dtype(jnp.bfloat16) if is_bf16 else jnp.dtype(jnp.float32)
    sublane = 16 if is_bf16 else 8

    # Free layout plumbing: NCHW -> (B, D). No padding, no post-slicing.
    x_flat = x_nchw.reshape(B, D).astype(compute_dtype)
    we_c = we.astype(compute_dtype)
    wd_c = wd.astype(compute_dtype)
    be_c = be.reshape(1, L).astype(jnp.float32)
    bd_c = bd.reshape(1, D).astype(jnp.float32)

    TB, vmem_needed = _choose_batch_tile(B, D, L, compute_dtype.itemsize,
                                         out_dtype.itemsize, block_batch, sublane)
    grid = (_cdiv(B, TB),)

    kernel = functools.partial(_ae_kernel,
                               latent_nonlinearity=latent_nonlinearity)

    xhat_spec = pl.BlockSpec((TB, D), lambda i: (i, 0))
    z_spec = pl.BlockSpec((TB, L), lambda i: (i, 0))
    if return_latent:
        out_shape = (jax.ShapeDtypeStruct((B, D), out_dtype),
                     jax.ShapeDtypeStruct((B, L), out_dtype))
        out_specs = (xhat_spec, z_spec)
    else:
        out_shape = jax.ShapeDtypeStruct((B, D), out_dtype)
        out_specs = xhat_spec

    compiler_kwargs = dict(dimension_semantics=("parallel",))
    # Only raise the scoped-VMEM limit if the (already capped) working set
    # would not fit the smallest default (16 MiB on v5e); keeps headroom on v7x.
    if vmem_needed > 12 * 1024 * 1024:
        compiler_kwargs["vmem_limit_bytes"] = min(int(vmem_needed * 3 // 2),
                                                  96 * 1024 * 1024)

    out = pl.pallas_call(
        kernel,
        out_shape=out_shape,
        grid_spec=pltpu.PrefetchScalarGridSpec(
            num_scalar_prefetch=0,
            grid=grid,
            in_specs=[
                pl.BlockSpec((TB, D), lambda i: (i, 0)),  # x (batch-tiled)
                pl.BlockSpec((D, L), lambda i: (0, 0)),   # We (resident, unpadded)
                pl.BlockSpec((1, L), lambda i: (0, 0)),   # be
                pl.BlockSpec((L, D), lambda i: (0, 0)),   # Wd (resident, unpadded)
                pl.BlockSpec((1, D), lambda i: (0, 0)),   # bd
            ],
            out_specs=out_specs,
        ),
        compiler_params=pltpu.CompilerParams(**compiler_kwargs),
    )(x_flat, we_c, be_c, wd_c, bd_c)

    if return_latent:
        x_hat_flat, z = out
        return x_hat_flat.reshape(B, C, H, W), z
    return out.reshape(B, C, H, W)


def init_params(key, d_in, dim_latent_space):
    """Deterministic Kaiming-style init (mirrors ae_utils.*_weights_init_kaiming)."""
    k_we, k_wd = jax.random.split(key, 2)
    we = jax.random.normal(k_we, (d_in, dim_latent_space), jnp.float32) * jnp.sqrt(2.0 / d_in)
    be = jnp.zeros((1, dim_latent_space), jnp.float32)
    wd = jax.random.normal(k_wd, (dim_latent_space, d_in), jnp.float32) * jnp.sqrt(2.0 / dim_latent_space)
    bd = jnp.zeros((1, d_in), jnp.float32)
    return we, be, wd, bd


if __name__ == "__main__":
    key = jax.random.PRNGKey(0)
    k_x, k_p, k_x2 = jax.random.split(key, 3)

    # Small NCHW input consistent with the module (spectrogram-bar-like).
    B, C, H, W = 2, 4, 16, 16
    dim_latent_space = 16
    D = C * H * W

    x = jax.random.normal(k_x, (B, C, H, W), jnp.float32)
    we, be, wd, bd = init_params(k_p, D, dim_latent_space)

    # Plain-JAX reference (same math, high precision).
    def ref_forward(x_in, nonlin):
        xf = x_in.reshape(x_in.shape[0], D)
        z_lin = jnp.dot(xf, we, precision=jax.lax.Precision.HIGHEST) + be
        if nonlin == "softmax":
            z_r = jax.nn.softmax(z_lin, axis=1)
        elif nonlin == "sigmoid":
            z_r = jax.nn.sigmoid(z_lin)
        elif nonlin == "tanh":
            z_r = jnp.tanh(z_lin)
        else:
            z_r = z_lin
        xh = (jnp.dot(z_r, wd, precision=jax.lax.Precision.HIGHEST) + bd).reshape(x_in.shape)
        return xh, z_r

    # 1) Default GenericAutoencoder: latent_nonlinearity=None, f32.
    x_hat, z = generic_autoencoder_forward(x, we, be, wd, bd,
                                           latent_nonlinearity=None)
    jax.block_until_ready((x_hat, z))
    xh_ref, z_ref = ref_forward(x, None)
    assert x_hat.shape == (B, C, H, W) and z.shape == (B, dim_latent_space)
    assert jnp.allclose(z, z_ref, atol=5e-2, rtol=5e-2)
    assert jnp.allclose(x_hat, xh_ref, atol=5e-2, rtol=5e-2)

    # 2) Softmax latent nonlinearity + ragged batch (exercises masked tail tile).
    B2 = 20
    x2 = jax.random.normal(k_x2, (B2, C, H, W), jnp.float32)
    x_hat_sm, z_sm = generic_autoencoder_forward(x2, we, be, wd, bd,
                                                 latent_nonlinearity="softmax",
                                                 block_batch=8)
    jax.block_until_ready((x_hat_sm, z_sm))
    xh_sm_ref, z_sm_ref = ref_forward(x2, "softmax")
    assert jnp.allclose(z_sm, z_sm_ref, atol=5e-2, rtol=5e-2)
    assert jnp.allclose(x_hat_sm, xh_sm_ref, atol=5e-2, rtol=5e-2)

    # 3) bf16 operand path (f32 accumulation, bf16 outputs), looser tolerance.
    x_hat_bf, z_bf = generic_autoencoder_forward(x, we, be, wd, bd,
                                                 latent_nonlinearity=None,
                                                 compute_dtype=jnp.bfloat16)
    jax.block_until_ready((x_hat_bf, z_bf))
    assert x_hat_bf.dtype == jnp.bfloat16 and z_bf.dtype == jnp.bfloat16
    assert jnp.allclose(z_bf.astype(jnp.float32), z_ref, atol=1.5e-1, rtol=1.5e-1)
    assert jnp.allclose(x_hat_bf.astype(jnp.float32), xh_ref, atol=1.5e-1, rtol=1.5e-1)

    # 4) x_hat-only variant (skips the z writeback entirely), tanh latent.
    x_hat_only = generic_autoencoder_forward(x, we, be, wd, bd,
                                             latent_nonlinearity="tanh",
                                             return_latent=False)
    jax.block_until_ready(x_hat_only)
    xh_tanh_ref, _ = ref_forward(x, "tanh")
    assert jnp.allclose(x_hat_only, xh_tanh_ref, atol=5e-2, rtol=5e-2)

    print("KERNEL_OK")
</pallas_src>

<mosaic_0001>
module attributes {stable_mosaic.version = 11 : i64} {
  func.func @_ae_kernel(%arg0: i32, %arg1: memref<2x1024xf32, #tpu.memory_space<vmem>>, %arg2: memref<1024x16xf32, #tpu.memory_space<vmem>>, %arg3: memref<1x16xf32, #tpu.memory_space<vmem>>, %arg4: memref<16x1024xf32, #tpu.memory_space<vmem>>, %arg5: memref<1x1024xf32, #tpu.memory_space<vmem>>, %arg6: memref<2x1024xf32, #tpu.memory_space<vmem>>, %arg7: memref<2x16xf32, #tpu.memory_space<vmem>>) attributes {dimension_semantics = [#tpu.dimension_semantics<parallel>], iteration_bounds = array<i64: 1>, scalar_prefetch = 0 : i64, scratch_operands = 0 : i64, tpu.core_type = #tpu.core_type<tc>, window_params = [{transform_indices = @transform_0, window_bounds = array<i64: 2, 1024>}, {pipeline_mode = #tpu.pipeline_mode<synchronous>, transform_indices = @transform_1, window_bounds = array<i64: 1024, 16>}, {pipeline_mode = #tpu.pipeline_mode<synchronous>, transform_indices = @transform_2, window_bounds = array<i64: 1, 16>}, {pipeline_mode = #tpu.pipeline_mode<synchronous>, transform_indices = @transform_3, window_bounds = array<i64: 16, 1024>}, {pipeline_mode = #tpu.pipeline_mode<synchronous>, transform_indices = @transform_4, window_bounds = array<i64: 1, 1024>}, {transform_indices = @transform_5, window_bounds = array<i64: 2, 1024>}, {transform_indices = @transform_6, window_bounds = array<i64: 2, 16>}]} {
    %c0 = arith.constant 0 : index
    %c0_0 = arith.constant 0 : index
    %0 = vector.load %arg1[%c0, %c0_0] : memref<2x1024xf32, #tpu.memory_space<vmem>>, vector<2x1024xf32>
    %c0_1 = arith.constant 0 : index
    %c0_2 = arith.constant 0 : index
    %1 = vector.load %arg2[%c0_1, %c0_2] : memref<1024x16xf32, #tpu.memory_space<vmem>>, vector<1024x16xf32>
    %cst = arith.constant dense<0.000000e+00> : vector<2x16xf32>
    %2 = tpu.matmul %0, %1, %cst {dimension_numbers = #tpu.dot_dimension_numbers<[1], [0], [0], [1], [0, 0, 1, 1], [], []>} : vector<2x1024xf32>, vector<1024x16xf32>, vector<2x16xf32> -> vector<2x16xf32>
    %c0_3 = arith.constant 0 : index
    %c0_4 = arith.constant 0 : index
    %3 = vector.load %arg3[%c0_3, %c0_4] : memref<1x16xf32, #tpu.memory_space<vmem>>, vector<1x16xf32>
    %4 = vector.broadcast %3 : vector<1x16xf32> to vector<2x16xf32>
    %5 = arith.addf %2, %4 : vector<2x16xf32>
    %c0_5 = arith.constant 0 : index
    %c0_6 = arith.constant 0 : index
    %6 = vector.load %arg7[%c0_5, %c0_6] : memref<2x16xf32, #tpu.memory_space<vmem>>, vector<2x16xf32>
    tpu.vector_store %arg7[%c0_5, %c0_6], %5 {strides = array<i32>} : memref<2x16xf32, #tpu.memory_space<vmem>>, vector<2x16xf32>,
    %c0_7 = arith.constant 0 : index
    %c0_8 = arith.constant 0 : index
    %7 = vector.load %arg4[%c0_7, %c0_8] : memref<16x1024xf32, #tpu.memory_space<vmem>>, vector<16x1024xf32>
    %cst_9 = arith.constant dense<0.000000e+00> : vector<2x1024xf32>
    %8 = tpu.matmul %5, %7, %cst_9 {dimension_numbers = #tpu.dot_dimension_numbers<[1], [0], [0], [1], [0, 0, 1, 1], [], []>} : vector<2x16xf32>, vector<16x1024xf32>, vector<2x1024xf32> -> vector<2x1024xf32>
    %c0_10 = arith.constant 0 : index
    %c0_11 = arith.constant 0 : index
    %9 = vector.load %arg5[%c0_10, %c0_11] : memref<1x1024xf32, #tpu.memory_space<vmem>>, vector<1x1024xf32>
    %10 = vector.broadcast %9 : vector<1x1024xf32> to vector<2x1024xf32>
    %11 = arith.addf %8, %10 : vector<2x1024xf32>
    %c0_12 = arith.constant 0 : index
    %c0_13 = arith.constant 0 : index
    %12 = vector.load %arg6[%c0_12, %c0_13] : memref<2x1024xf32, #tpu.memory_space<vmem>>, vector<2x1024xf32>
    tpu.vector_store %arg6[%c0_12, %c0_13], %11 {strides = array<i32>} : memref<2x1024xf32, #tpu.memory_space<vmem>>, vector<2x1024xf32>,
    return
  }
  func.func @transform_0(%arg0: i32) -> (i32, i32) {
    %c0_i32 = arith.constant 0 : i32
    %c0_i32_0 = arith.constant 0 : i32
    return %arg0, %c0_i32 : i32, i32
  }
  func.func @transform_1(%arg0: i32) -> (i32, i32) {
    %c0_i32 = arith.constant 0 : i32
    %c0_i32_0 = arith.constant 0 : i32
    %c0_i32_1 = arith.constant 0 : i32
    return %c0_i32, %c0_i32_0 : i32, i32
  }
  func.func @transform_2(%arg0: i32) -> (i32, i32) {
    %c0_i32 = arith.constant 0 : i32
    %c0_i32_0 = arith.constant 0 : i32
    %c0_i32_1 = arith.constant 0 : i32
    return %c0_i32, %c0_i32_0 : i32, i32
  }
  func.func @transform_3(%arg0: i32) -> (i32, i32) {
    %c0_i32 = arith.constant 0 : i32
    %c0_i32_0 = arith.constant 0 : i32
    %c0_i32_1 = arith.constant 0 : i32
    return %c0_i32, %c0_i32_0 : i32, i32
  }
  func.func @transform_4(%arg0: i32) -> (i32, i32) {
    %c0_i32 = arith.constant 0 : i32
    %c0_i32_0 = arith.constant 0 : i32
    %c0_i32_1 = arith.constant 0 : i32
    return %c0_i32, %c0_i32_0 : i32, i32
  }
  func.func @transform_5(%arg0: i32) -> (i32, i32) {
    %c0_i32 = arith.constant 0 : i32
    %c0_i32_0 = arith.constant 0 : i32
    return %arg0, %c0_i32 : i32, i32
  }
  func.func @transform_6(%arg0: i32) -> (i32, i32) {
    %c0_i32 = arith.constant 0 : i32
    %c0_i32_0 = arith.constant 0 : i32
    return %arg0, %c0_i32 : i32, i32
  }
}

</mosaic_0001>

<bundles_post_ra>
// kernel: tpu_custom_call.1
= control target key start
LH: loop header
LB: loop body
LE: loop exit
PB: predicated region body
PF: predicated region fallthrough
CT: control target
= control target key end

     0   :  { %12 = vsyncpa [#allocation3], 0  ;;  %v1250_v47 = vmov 1983009808   ;;  %v167_v49 = vlaneseq  ;;  %s1783_s0 = inlined_call_operand.vmem [shape: f32[2,1024], index: 0, kind: input, shape index: {}]   ;;  %s1784_s1 = inlined_call_operand.vmem [shape: f32[1024,16], index: 1, kind: input, shape index: {}]   ;;  %s1785_s2 = inlined_call_operand.vmem [shape: f32[1,16], index: 2, kind: input, shape index: {}]   ;;  %s1786_s3 = inlined_call_operand.vmem [shape: f32[16,1024], index: 3, kind: input, shape index: {}]   ;;  %s1787_s4 = inlined_call_operand.vmem [shape: f32[1,1024], index: 4, kind: input, shape index: {}]   ;;  %s1788_s5 = inlined_call_operand.hbm [shape: f32[2,1024], index: 5, kind: output, shape index: {0}]   ;;  %s1789_s6 = inlined_call_operand.hbm [shape: f32[2,16], index: 6, kind: output, shape index: {1}]  }
   0x1   :  { %v42_v0 = vld [vmem:[%s1784_s1 + $0x80] sm:$0xff]  ;;  %v43_v1 = vld [vmem:[%s1784_s1 + $0x88] sm:$0xff]  ;;  %v44_v11 = vld [vmem:[%s1784_s1 + $0x90] sm:$0xff]  ;;  %v165_v48 = vunpack.c.l.s4 %v1250_v47 }
   0x2   :  { %v26_v2 = vld [vmem:[%s1784_s1] sm:$0xff]  ;;  %v1052_v3 = vpack.c.bf16 %v43_v1, %v42_v0  ;;  %v27_v4 = vld [vmem:[%s1784_s1 + $0x8] sm:$0xff]  ;;  %v45_v13 = vld [vmem:[%s1784_s1 + $0x98] sm:$0xff]  ;;  %v1415_v0 = vshrl.u32 %v167_v49, 7 }
   0x3   :  { %v74_v5 = vld [vmem:[%s1784_s1 + $0x180] sm:$0xff]  ;;  %v75_v6 = vld [vmem:[%s1784_s1 + $0x188] sm:$0xff]  ;;  %v1054_v7 = vpack.c.bf16 %v27_v4, %v26_v2  ;;  %v28_v14 = vld [vmem:[%s1784_s1 + $0x10] sm:$0xff]  ;;  %v1056_v16 = vpack.c.bf16 %v45_v13, %v44_v11  ;;  %v166_v63 = vunpack.c.0.s8 %v165_v48 }
   0x4   :  { %v1084_v8 = vpack.c.bf16 %v75_v6, %v74_v5  ;;  %v58_v9 = vld [vmem:[%s1784_s1 + $0x100] sm:$0xff]  ;;  %v59_v10 = vld [vmem:[%s1784_s1 + $0x108] sm:$0xff]  ;;  %1053 = vmatprep.subr.bf16.mxu0 %v1052_v3  ;;  %v29_v15 = vld [vmem:[%s1784_s1 + $0x18] sm:$0xff] }
   0x5   :  { %v1086_v12 = vpack.c.bf16 %v59_v10, %v58_v9  ;;  %1055 = vmatpush3.bf16.msra.mxu0 %v1054_v7  ;;  %v1058_v17 = vpack.c.bf16 %v29_v15, %v28_v14  ;;  %v76_v18 = vld [vmem:[%s1784_s1 + $0x190] sm:$0xff]  ;;  %v77_v19 = vld [vmem:[%s1784_s1 + $0x198] sm:$0xff]  ;;  %v46_v23 = vld [vmem:[%s1784_s1 + $0xa0] sm:$0xff]  ;;  %v1442_v13 = vsub.s32 %v166_v63, %v1415_v0 }
   0x6   :  { %1085 = vmatprep.subr.bf16.mxu1 %v1084_v8  ;;  %v60_v20 = vld [vmem:[%s1784_s1 + $0x110] sm:$0xff]  ;;  %v1088_v21 = vpack.c.bf16 %v77_v19, %v76_v18  ;;  %v61_v22 = vld [vmem:[%s1784_s1 + $0x118] sm:$0xff]  ;;  %v47_v24 = vld [vmem:[%s1784_s1 + $0xa8] sm:$0xff]  ;;  %1057 = vmatprep.subr.bf16.mxu0 %v1056_v16 }
   0x7   :  { %1087 = vmatpush3.bf16.msra.mxu1 %v1086_v12  ;;  %v1090_v25 = vpack.c.bf16 %v61_v22, %v60_v20  ;;  %v1060_v26 = vpack.c.bf16 %v47_v24, %v46_v23  ;;  %v30_v27 = vld [vmem:[%s1784_s1 + $0x20] sm:$0xff]  ;;  %v31_v28 = vld [vmem:[%s1784_s1 + $0x28] sm:$0xff]  ;;  %v48_v35 = vld [vmem:[%s1784_s1 + $0xb0] sm:$0xff] }
   0x8   :  { %v78_v29 = vld [vmem:[%s1784_s1 + $0x1a0] sm:$0xff]  ;;  %1089 = vmatprep.subr.bf16.mxu1 %v1088_v21  ;;  %v79_v30 = vld [vmem:[%s1784_s1 + $0x1a8] sm:$0xff]  ;;  %v1062_v33 = vpack.c.bf16 %v31_v28, %v30_v27  ;;  %v49_v36 = vld [vmem:[%s1784_s1 + $0xb8] sm:$0xff] }
   0x9   :  { %v62_v31 = vld [vmem:[%s1784_s1 + $0x120] sm:$0xff]  ;;  %v63_v32 = vld [vmem:[%s1784_s1 + $0x128] sm:$0xff]  ;;  %1059 = vmatpush3.bf16.msra.mxu0 %v1058_v17  ;;  %v1092_v34 = vpack.c.bf16 %v79_v30, %v78_v29  ;;  %v32_v37 = vld [vmem:[%s1784_s1 + $0x30] sm:$0xff]  ;;  %v1064_v39 = vpack.c.bf16 %v49_v36, %v48_v35 }
   0xa   :  { %1061 = vmatprep.subr.bf16.mxu0 %v1060_v26  ;;  %v1094_v38 = vpack.c.bf16 %v63_v32, %v62_v31  ;;  %v33_v40 = vld [vmem:[%s1784_s1 + $0x38] sm:$0xff]  ;;  %v80_v41 = vld [vmem:[%s1784_s1 + $0x1b0] sm:$0xff]  ;;  %v50_v46 = vld [vmem:[%s1784_s1 + $0xc0] sm:$0xff] }
   0xb   :  { %1091 = vmatpush3.bf16.msra.mxu1 %v1090_v25  ;;  %v81_v42 = vld [vmem:[%s1784_s1 + $0x1b8] sm:$0xff]  ;;  %v64_v44 = vld [vmem:[%s1784_s1 + $0x130] sm:$0xff]  ;;  %v51_v50 = vld [vmem:[%s1784_s1 + $0xc8] sm:$0xff]  ;;  %v1066_v51 = vpack.c.bf16 %v33_v40, %v32_v37 }
   0xc   :  { %1093 = vmatprep.subr.bf16.mxu1 %v1092_v34  ;;  %v1096_v43 = vpack.c.bf16 %v81_v42, %v80_v41  ;;  %v65_v45 = vld [vmem:[%s1784_s1 + $0x138] sm:$0xff]  ;;  %v82_v52 = vld [vmem:[%s1784_s1 + $0x1c0] sm:$0xff]  ;;  %v83_v53 = vld [vmem:[%s1784_s1 + $0x1c8] sm:$0xff]  ;;  %v1068_v55 = vpack.c.bf16 %v51_v50, %v50_v46 }
   0xd   :  { %1063 = vmatpush3.bf16.msra.mxu0 %v1062_v33  ;;  %v1098_v54 = vpack.c.bf16 %v65_v45, %v64_v44  ;;  %v34_v56 = vld [vmem:[%s1784_s1 + $0x40] sm:$0xff]  ;;  %v35_v57 = vld [vmem:[%s1784_s1 + $0x48] sm:$0xff]  ;;  %v1100_v59 = vpack.c.bf16 %v83_v53, %v82_v52  ;;  %v52_v61 = vld [vmem:[%s1784_s1 + $0xd0] sm:$0xff] }
   0xe   :  { %1065 = vmatprep.subr.bf16.mxu0 %v1064_v39  ;;  %v66_v58 = vld [vmem:[%s1784_s1 + $0x140] sm:$0xff]  ;;  %v67_v60 = vld [vmem:[%s1784_s1 + $0x148] sm:$0xff]  ;;  %v53_v62 = vld [vmem:[%s1784_s1 + $0xd8] sm:$0xff]  ;;  %v1070_v3 = vpack.c.bf16 %v35_v57, %v34_v56 }
   0xf   :  { %1095 = vmatpush3.bf16.msra.mxu1 %v1094_v38  ;;  %v84_v1 = vld [vmem:[%s1784_s1 + $0x1d0] sm:$0xff]  ;;  %v85_v2 = vld [vmem:[%s1784_s1 + $0x1d8] sm:$0xff]  ;;  %v1102_v4 = vpack.c.bf16 %v67_v60, %v66_v58  ;;  %v1072_v5 = vpack.c.bf16 %v53_v62, %v52_v61  ;;  %v54_v11 = vld [vmem:[%s1784_s1 + $0xe0] sm:$0xff] }
  0x10   :  { %1097 = vmatprep.subr.bf16.mxu1 %v1096_v43  ;;  %v36_v6 = vld [vmem:[%s1784_s1 + $0x50] sm:$0xff]  ;;  %v37_v7 = vld [vmem:[%s1784_s1 + $0x58] sm:$0xff]  ;;  %v1104_v9 = vpack.c.bf16 %v85_v2, %v84_v1  ;;  %v55_v12 = vld [vmem:[%s1784_s1 + $0xe8] sm:$0xff] }
  0x11   :  { %1067 = vmatpush3.bf16.msra.mxu0 %v1066_v51  ;;  %v68_v8 = vld [vmem:[%s1784_s1 + $0x150] sm:$0xff]  ;;  %v69_v10 = vld [vmem:[%s1784_s1 + $0x158] sm:$0xff]  ;;  %v86_v14 = vld [vmem:[%s1784_s1 + $0x1e0] sm:$0xff]  ;;  %v1074_v16 = vpack.c.bf16 %v37_v7, %v36_v6  ;;  %v1076_v19 = vpack.c.bf16 %v55_v12, %v54_v11 }
  0x12   :  { %1069 = vmatprep.subr.bf16.mxu0 %v1068_v55  ;;  %v87_v15 = vld [vmem:[%s1784_s1 + $0x1e8] sm:$0xff]  ;;  %v38_v17 = vld [vmem:[%s1784_s1 + $0x60] sm:$0xff]  ;;  %v1106_v18 = vpack.c.bf16 %v69_v10, %v68_v8  ;;  %v56_v25 = vld [vmem:[%s1784_s1 + $0xf0] sm:$0xff] }
  0x13   :  { %1099 = vmatpush3.bf16.msra.mxu1 %v1098_v54  ;;  %v39_v20 = vld [vmem:[%s1784_s1 + $0x68] sm:$0xff]  ;;  %v70_v21 = vld [vmem:[%s1784_s1 + $0x160] sm:$0xff]  ;;  %v1108_v23 = vpack.c.bf16 %v87_v15, %v86_v14  ;;  %v57_v26 = vld [vmem:[%s1784_s1 + $0xf8] sm:$0xff] }
  0x14   :  { %1101 = vmatprep.subr.bf16.mxu1 %v1100_v59  ;;  %v24_v22 = vld [vmem:[%s1783_s0] sm:$0xff]  ;;  %v71_v24 = vld [vmem:[%s1784_s1 + $0x168] sm:$0xff]  ;;  %v88_v29 = vld [vmem:[%s1784_s1 + $0x1f0] sm:$0xff]  ;;  %v1078_v31 = vpack.c.bf16 %v39_v20, %v38_v17  ;;  %v1080_v35 = vpack.c.bf16 %v57_v26, %v56_v25 }
  0x15   :  { %1071 = vmatpush3.bf16.msra.mxu0 %v1070_v3  ;;  %v170_v27 = vrot.slane %v24_v22, %v1442_v13  ;;  %v163_v28 = vcombine.high %v24_v22, %v24_v22  ;;  %v89_v30 = vld [vmem:[%s1784_s1 + $0x1f8] sm:$0xff]  ;;  %v1110_v34 = vpack.c.bf16 %v71_v24, %v70_v21  ;;  %v40_v36 = vld [vmem:[%s1784_s1 + $0x70] sm:$0xff]  ;;  %v106_v41 = vld [vmem:[%s1784_s1 + $0x280] sm:$0xff] }
  0x16   :  { %1073 = vmatprep.subr.bf16.mxu0 %v1072_v5  ;;  %v41_v37 = vld [vmem:[%s1784_s1 + $0x78] sm:$0xff]  ;;  %v72_v38 = vld [vmem:[%s1784_s1 + $0x170] sm:$0xff]  ;;  %v1112_v39 = vpack.c.bf16 %v89_v30, %v88_v29  ;;  %v107_v42 = vld [vmem:[%s1784_s1 + $0x288] sm:$0xff] }
  0x17   :  { %1103 = vmatpush3.bf16.msra.mxu1 %v1102_v4  ;;  %v178_v32 = vcombine.high %v170_v27, %v170_v27  ;;  %v177_v33 = vrot.slane %v163_v28, %v1442_v13  ;;  %v73_v40 = vld [vmem:[%s1784_s1 + $0x178] sm:$0xff]  ;;  %v138_v44 = vld [vmem:[%s1784_s1 + $0x380] sm:$0xff]  ;;  %v139_v45 = vld [vmem:[%s1784_s1 + $0x388] sm:$0xff]  ;;  %v1082_v46 = vpack.c.bf16 %v41_v37, %v40_v36  ;;  %v1116_v48 = vpack.c.bf16 %v107_v42, %v106_v41 }
  0x18   :  { %1105 = vmatprep.subr.bf16.mxu1 %v1104_v9  ;;  %v1114_v47 = vpack.c.bf16 %v73_v40, %v72_v38  ;;  %v90_v49 = vld [vmem:[%s1784_s1 + $0x200] sm:$0xff]  ;;  %v91_v50 = vld [vmem:[%s1784_s1 + $0x208] sm:$0xff]  ;;  %v1148_v52 = vpack.c.bf16 %v139_v45, %v138_v44  ;;  %v108_v54 = vld [vmem:[%s1784_s1 + $0x290] sm:$0xff] }
  0x19   :  { %1075 = vmatpush3.bf16.msra.mxu0 %v1074_v16  ;;  %269 = vmatprep.mubr.f32.mxu0 %v178_v32  ;;  %v179_v43 = vcombine.high %v177_v33, %v177_v33  ;;  %v122_v51 = vld [vmem:[%s1784_s1 + $0x300] sm:$0xff]  ;;  %v123_v53 = vld [vmem:[%s1784_s1 + $0x308] sm:$0xff]  ;;  %v109_v55 = vld [vmem:[%s1784_s1 + $0x298] sm:$0xff]  ;;  %v1118_v58 = vpack.c.bf16 %v91_v50, %v90_v49 }
  0x1a   :  { %1077 = vmatprep.subr.bf16.mxu0 %v1076_v19  ;;  %v140_v56 = vld [vmem:[%s1784_s1 + $0x390] sm:$0xff]  ;;  %v141_v57 = vld [vmem:[%s1784_s1 + $0x398] sm:$0xff]  ;;  %v1150_v59 = vpack.c.bf16 %v123_v53, %v122_v51  ;;  %v1120_v60 = vpack.c.bf16 %v109_v55, %v108_v54  ;;  %v110_v3 = vld [vmem:[%s1784_s1 + $0x2a0] sm:$0xff] }
  0x1b   :  { %1107 = vmatpush3.bf16.msra.mxu1 %v1106_v18  ;;  %339 = vmatprep.mubr.f32.mxu1 %v179_v43  ;;  %v92_v61 = vld [vmem:[%s1784_s1 + $0x210] sm:$0xff]  ;;  %v93_v62 = vld [vmem:[%s1784_s1 + $0x218] sm:$0xff]  ;;  %v1152_v1 = vpack.c.bf16 %v141_v57, %v140_v56  ;;  %v111_v4 = vld [vmem:[%s1784_s1 + $0x2a8] sm:$0xff] }
  0x1c   :  { %1109 = vmatprep.subr.bf16.mxu1 %v1108_v23  ;;  %v124_v63 = vld [vmem:[%s1784_s1 + $0x310] sm:$0xff]  ;;  %v125_v2 = vld [vmem:[%s1784_s1 + $0x318] sm:$0xff]  ;;  %v142_v5 = vld [vmem:[%s1784_s1 + $0x3a0] sm:$0xff]  ;;  %v1122_v7 = vpack.c.bf16 %v93_v62, %v92_v61  ;;  %v1124_v9 = vpack.c.bf16 %v111_v4, %v110_v3 }
  0x1d   :  { %1079 = vmatpush3.bf16.msra.mxu0 %v1078_v31  ;;  %v143_v6 = vld [vmem:[%s1784_s1 + $0x3a8] sm:$0xff]  ;;  %v1154_v8 = vpack.c.bf16 %v125_v2, %v124_v63  ;;  %v94_v10 = vld [vmem:[%s1784_s1 + $0x220] sm:$0xff]  ;;  %v112_v16 = vld [vmem:[%s1784_s1 + $0x2b0] sm:$0xff] }
  0x1e   :  { %1081 = vmatprep.subr.bf16.mxu0 %v1080_v35  ;;  %v95_v11 = vld [vmem:[%s1784_s1 + $0x228] sm:$0xff]  ;;  %v126_v12 = vld [vmem:[%s1784_s1 + $0x320] sm:$0xff]  ;;  %v1156_v14 = vpack.c.bf16 %v143_v6, %v142_v5  ;;  %v113_v17 = vld [vmem:[%s1784_s1 + $0x2b8] sm:$0xff] }
  0x1f   :  { %1111 = vmatpush3.bf16.msra.mxu1 %v1110_v34  ;;  %v127_v15 = vld [vmem:[%s1784_s1 + $0x328] sm:$0xff]  ;;  %v144_v18 = vld [vmem:[%s1784_s1 + $0x3b0] sm:$0xff]  ;;  %v145_v19 = vld [vmem:[%s1784_s1 + $0x3b8] sm:$0xff]  ;;  %v1126_v20 = vpack.c.bf16 %v95_v11, %v94_v10  ;;  %v1128_v23 = vpack.c.bf16 %v113_v17, %v112_v16 }
  0x20   :  { %1113 = vmatprep.subr.bf16.mxu1 %v1112_v39  ;;  %v96_v21 = vld [vmem:[%s1784_s1 + $0x230] sm:$0xff]  ;;  %v1158_v22 = vpack.c.bf16 %v127_v15, %v126_v12  ;;  %v97_v24 = vld [vmem:[%s1784_s1 + $0x238] sm:$0xff]  ;;  %v114_v28 = vld [vmem:[%s1784_s1 + $0x2c0] sm:$0xff] }
  0x21   :  { %1083 = vmatpush3.bf16.msra.mxu0 %v1082_v46  ;;  %v128_v25 = vld [vmem:[%s1784_s1 + $0x330] sm:$0xff]  ;;  %v129_v26 = vld [vmem:[%s1784_s1 + $0x338] sm:$0xff]  ;;  %v115_v29 = vld [vmem:[%s1784_s1 + $0x2c8] sm:$0xff] }
  0x22   :  { %1117 = vmatprep.subr.bf16.mxu0 %v1116_v48  ;;  %v146_v30 = vld [vmem:[%s1784_s1 + $0x3c0] sm:$0xff]  ;;  %v147_v31 = vld [vmem:[%s1784_s1 + $0x3c8] sm:$0xff] }
  0x23   :  { %1115 = vmatpush3.bf16.msra.mxu1 %v1114_v47  ;;  %v25_v32 = vld [vmem:[%s1783_s0 + $0x8] sm:$0xff] }
  0x24   :  { %1149 = vmatprep.subr.bf16.mxu1 %v1148_v52  ;;  %270 = vmatmul.mubr.f32.vlgmr.msra.gmra.mrb[0].mxu0 %v170_v27  ;;  %v1160_v27 = vpack.c.bf16 %v145_v19, %v144_v18 }
  0x25   :  { %1119 = vmatpush3.bf16.msra.mxu0 %v1118_v58 }
  0x26   :  { %340 = vmatmul.mubr.f32.vlgmr.msra.gmra.mrb[0].mxu1 %v177_v33  ;;  %1121 = vmatprep.subr.bf16.mxu0 %v1120_v60 }
  0x27   :  { %1151 = vmatpush3.bf16.msra.mxu1 %v1150_v59 }
  0x28   :  { %1153 = vmatprep.subr.bf16.mxu1 %v1152_v1 }
  0x29   :  { %1123 = vmatpush3.bf16.msra.mxu0 %v1122_v7 }
  0x2a   :  { %1125 = vmatprep.subr.bf16.mxu0 %v1124_v9 }
  0x2b   :  { %1155 = vmatpush3.bf16.msra.mxu1 %v1154_v8 }
  0x2c   :  { %1157 = vmatprep.subr.bf16.mxu1 %v1156_v14 }
  0x2d   :  { %13 = vsyncpa [#allocation5], 0  ;;  %1127 = vmatpush3.bf16.msra.mxu0 %v1126_v20  ;;  %v1130_v33 = vpack.c.bf16 %v97_v24, %v96_v21  ;;  %v1603_v34 = vrot.slane %v25_v32, %v1442_v13  ;;  %v180_v35 = vcombine.high %v25_v32, %v25_v32  ;;  %v1162_v36 = vpack.c.bf16 %v129_v26, %v128_v25  ;;  %v98_v38 = vld [vmem:[%s1784_s1 + $0x240] sm:$0xff]  ;;  %v99_v39 = vld [vmem:[%s1784_s1 + $0x248] sm:$0xff]  ;;  %s1252_s20 = smov [#allocation4]  }
  0x2e   :  { %1129 = vmatprep.subr.bf16.mxu0 %v1128_v23  ;;  %v1132_v37 = vpack.c.bf16 %v115_v29, %v114_v28  ;;  %v130_v40 = vld [vmem:[%s1784_s1 + $0x340] sm:$0xff]  ;;  %v1164_v41 = vpack.c.bf16 %v147_v31, %v146_v30  ;;  %v131_v42 = vld [vmem:[%s1784_s1 + $0x348] sm:$0xff]  ;;  %v116_v43 = vld [vmem:[%s1784_s1 + $0x2d0] sm:$0xff]  ;;  %v1134_v49 = vpack.c.bf16 %v99_v39, %v98_v38  ;;  %v1251_v39 = vmov 0.0   ;;  %s895_s21 = sshll.u32 %s1252_s20, 4  ;;  %s896_s21 = int_to_ptr.vmem [resolvable:$true] %s895_s21 }
  0x2f   :  { %1159 = vmatpush3.bf16.msra.mxu1 %v1158_v22  ;;  %v117_v44 = vld [vmem:[%s1784_s1 + $0x2d8] sm:$0xff]  ;;  %v195_v45 = vcombine.high %v1603_v34, %v1603_v34  ;;  %v194_v46 = vrot.slane %v180_v35, %v1442_v13  ;;  %v148_v47 = vld [vmem:[%s1784_s1 + $0x3d0] sm:$0xff]  ;;  %v1166_v51 = vpack.c.bf16 %v131_v42, %v130_v40  ;;  %v118_v58 = vld [vmem:[%s1784_s1 + $0x2e0] sm:$0xff]  ;;  %vm545_vm0 = vcmask 130048   ;;  %p1207_p1 = scmp.lt.s32.totalorder %s896_s21, %s896_s21 }
  0x30   :  { %1161 = vmatprep.subr.bf16.mxu1 %v1160_v27  ;;  %v149_v48 = vld [vmem:[%s1784_s1 + $0x3d8] sm:$0xff]  ;;  %v1136_v52 = vpack.c.bf16 %v117_v44, %v116_v43  ;;  %v100_v53 = vld [vmem:[%s1784_s1 + $0x250] sm:$0xff]  ;;  %v119_v59 = vld [vmem:[%s1784_s1 + $0x2e8] sm:$0xff]  ;;  %vm485_vm1 = vcmask 123904  }
  0x31   :  { %1131 = vmatpush3.bf16.msra.mxu0 %v1130_v33  ;;  %409 = vmatprep.mubr.f32.mxu0 %v195_v45  ;;  %v196_v50 = vcombine.high %v194_v46, %v194_v46  ;;  %v101_v54 = vld [vmem:[%s1784_s1 + $0x258] sm:$0xff]  ;;  %v132_v55 = vld [vmem:[%s1784_s1 + $0x350] sm:$0xff]  ;;  %v1168_v56 = vpack.c.bf16 %v149_v48, %v148_v47  ;;  %v150_v60 = vld [vmem:[%s1784_s1 + $0x3e0] sm:$0xff]  ;;  %v1140_v1 = vpack.c.bf16 %v119_v59, %v118_v58 }
  0x32   :  { %1133 = vmatprep.subr.bf16.mxu0 %v1132_v37  ;;  %v133_v57 = vld [vmem:[%s1784_s1 + $0x358] sm:$0xff]  ;;  %v151_v61 = vld [vmem:[%s1784_s1 + $0x3e8] sm:$0xff]  ;;  %v1138_v62 = vpack.c.bf16 %v101_v54, %v100_v53  ;;  %v102_v2 = vld [vmem:[%s1784_s1 + $0x260] sm:$0xff] }
  0x33   :  { %1163 = vmatpush3.bf16.msra.mxu1 %v1162_v36  ;;  %479 = vmatprep.mubr.f32.mxu1 %v196_v50  ;;  %v1170_v63 = vpack.c.bf16 %v133_v57, %v132_v55  ;;  %v103_v3 = vld [vmem:[%s1784_s1 + $0x268] sm:$0xff]  ;;  %v134_v4 = vld [vmem:[%s1784_s1 + $0x360] sm:$0xff]  ;;  %v1172_v5 = vpack.c.bf16 %v151_v61, %v150_v60  ;;  %v120_v7 = vld [vmem:[%s1784_s1 + $0x2f0] sm:$0xff] }
  0x34   :  { %1165 = vmatprep.subr.bf16.mxu1 %v1164_v41  ;;  %v135_v6 = vld [vmem:[%s1784_s1 + $0x368] sm:$0xff]  ;;  %v121_v8 = vld [vmem:[%s1784_s1 + $0x2f8] sm:$0xff]  ;;  %v152_v9 = vld [vmem:[%s1784_s1 + $0x3f0] sm:$0xff]  ;;  %v1142_v11 = vpack.c.bf16 %v103_v3, %v102_v2 }
  0x35   :  { %1135 = vmatpush3.bf16.msra.mxu0 %v1134_v49  ;;  %v153_v10 = vld [vmem:[%s1784_s1 + $0x3f8] sm:$0xff]  ;;  %v1174_v12 = vpack.c.bf16 %v135_v6, %v134_v4  ;;  %v1144_v14 = vpack.c.bf16 %v121_v8, %v120_v7  ;;  %v104_v15 = vld [vmem:[%s1784_s1 + $0x270] sm:$0xff]  ;;  %v488_v22 = vld [vmem:[%s1786_s3 + $0x8] sm:$0xff] }
  0x36   :  { %1137 = vmatprep.subr.bf16.mxu0 %v1136_v52  ;;  %v105_v16 = vld [vmem:[%s1784_s1 + $0x278] sm:$0xff]  ;;  %v1176_v17 = vpack.c.bf16 %v153_v10, %v152_v9  ;;  %v136_v18 = vld [vmem:[%s1784_s1 + $0x370] sm:$0xff]  ;;  %v496_v23 = vld [vmem:[%s1786_s3 + $0x48] sm:$0xff] }
  0x37   :  { %1167 = vmatpush3.bf16.msra.mxu1 %v1166_v51  ;;  %v137_v19 = vld [vmem:[%s1784_s1 + $0x378] sm:$0xff]  ;;  %v1146_v20 = vpack.c.bf16 %v105_v16, %v104_v15  ;;  %v1180_v25 = vpack.c.bf16 %v496_v23, %v488_v22  ;;  %v487_v27 = vld [vmem:[%s1786_s3] sm:$0xff]  ;;  %v489_v31 = vld [vmem:[%s1786_s3 + $0x10] sm:$0xff] }
  0x38   :  { %1169 = vmatprep.subr.bf16.mxu1 %v1168_v56  ;;  %v1178_v21 = vpack.c.bf16 %v137_v19, %v136_v18  ;;  %v490_v24 = vld [vmem:[%s1786_s3 + $0x18] sm:$0xff]  ;;  %v495_v28 = vld [vmem:[%s1786_s3 + $0x40] sm:$0xff]  ;;  %v497_v32 = vld [vmem:[%s1786_s3 + $0x50] sm:$0xff] }
  0x39   :  { %1139 = vmatpush3.bf16.msra.mxu0 %v1138_v62  ;;  %v498_v26 = vld [vmem:[%s1786_s3 + $0x58] sm:$0xff]  ;;  %v1182_v30 = vpack.c.bf16 %v495_v28, %v487_v27  ;;  %v1186_v33 = vpack.c.bf16 %v497_v32, %v489_v31  ;;  %v500_v35 = vld [vmem:[%s1786_s3 + $0x68] sm:$0xff]  ;;  %v907_v42 = vld [vmem:[%s1785_s2] ss:$0 sm:$0xff] }
  0x3a   :  { %1141 = vmatprep.subr.bf16.mxu0 %v1140_v1  ;;  %v1184_v29 = vpack.c.bf16 %v498_v26, %v490_v24  ;;  %v494_v36 = vld [vmem:[%s1786_s3 + $0x38] sm:$0xff]  ;;  %v491_v53 = vld [vmem:[%s1786_s3 + $0x20] sm:$0xff]  ;;  %v493_v57 = vld [vmem:[%s1786_s3 + $0x30] sm:$0xff] }
  0x3b   :  { %1171 = vmatpush3.bf16.msra.mxu1 %v1170_v63  ;;  %v502_v38 = vld [vmem:[%s1786_s3 + $0x78] sm:$0xff]  ;;  %v499_v56 = vld [vmem:[%s1786_s3 + $0x60] sm:$0xff]  ;;  %v501_v58 = vld [vmem:[%s1786_s3 + $0x70] sm:$0xff] }
  0x3c   :  { %1173 = vmatprep.subr.bf16.mxu1 %v1172_v5  ;;  %v1192_v40 = vpack.c.bf16 %v502_v38, %v494_v36  ;;  %v1190_v61 = vpack.c.bf16 %v499_v56, %v491_v53  ;;  %v1194_v62 = vpack.c.bf16 %v501_v58, %v493_v57 }
  0x3d   :  { %1143 = vmatpush3.bf16.msra.mxu0 %v1142_v11 }
  0x3e   :  { %1145 = vmatprep.subr.bf16.mxu0 %v1144_v14 }
  0x3f   :  { %1175 = vmatpush3.bf16.msra.mxu1 %v1174_v12 }
  0x40   :  { %1177 = vmatprep.subr.bf16.mxu1 %v1176_v17 }
  0x41   :  { %1147 = vmatpush3.bf16.msra.mxu0 %v1146_v20 }
  0x42   :  { %1181 = vmatprep.subr.bf16.mxu0 %v1180_v25 }
  0x43   :  { %1179 = vmatpush3.bf16.msra.mxu1 %v1178_v21 }
  0x44   :  { %410 = vmatmul.mubr.f32.vlgmr.msra.gmra.mrb[2].mxu0 %v1603_v34  ;;  %1185 = vmatprep.subr.bf16.mxu1 %v1184_v29  ;;  %v492_v34 = vld [vmem:[%s1786_s3 + $0x28] sm:$0xff]  ;;  %s1202_s3 = scalar_lea.vmem %s896_s21, 32 }
  0x45   :  { %1183 = vmatpush1.bf16.msra.mxu0 %v1182_v30  ;;  %v1188_v37 = vpack.c.bf16 %v500_v35, %v492_v34  ;;  %613 = vmatprep.mubr.f32.mxu0 %v1251_v39  ;;  %p1203_p0 = scmp.ne.s32.totalorder %s896_s21, %s1202_s3  ;;  %p1208_p2 = scmp.lt.s32.totalorder %s1202_s3, %s1202_s3 }
  0x46   :  { %480 = vmatmul.mubr.f32.vlgmr.msra.gmra.mrb[2].mxu1 %v194_v46 }
  0x47   :  { %1187 = vmatpush1.bf16.msra.mxu1 %v1186_v33  ;;  %684 = vmatprep.mubr.f32.mxu1 %v1251_v39  ;;  %p1209_p3 = por %p1208_p2, %p1207_p1 }
  0x48   :  { %1189 = vmatprep.subr.bf16.mxu0 %v1188_v37  ;;  %1193 = vmatprep.subr.bf16.mxu1 %v1192_v40 }
  0x49   :  { %p1210_p4 = pnand %p1209_p3, %p1203_p0 }
  0xf7   :  { %v944_v41 = vpop.f32.mrb[0].mxu0 }
  0xf8   :  { %v945_v43 = vpop.f32.mrb[1].mxu0 }
  0xf9   :  { %v979_v44 = vpop.f32.mrb[0].mxu1  ;;  %v946_v45 = vadd.f32 %v945_v43, %v944_v41 }
  0xfa   :  { %v980_v46 = vpop.f32.mrb[1].mxu1 }
  0xfb   :  { %v981_v47 = vadd.f32 %v980_v46, %v979_v44  ;;  %v272_v48 = vadd.f32 %v946_v45, %v907_v42 }
  0xfd   :  { %v342_v49 = vadd.f32 %v981_v47, %v272_v48 }
 0x117   :  { %v1014_v50 = vpop.f32.mrb[2].mxu0 }
 0x118   :  { %v1015_v51 = vpop.f32.mrb[3].mxu0 }
 0x119   :  { %v1049_v52 = vpop.f32.mrb[2].mxu1  ;;  %v1016_v54 = vadd.f32 %v1015_v51, %v1014_v50 }
 0x11a   :  { %v1050_v55 = vpop.f32.mrb[3].mxu1 }
 0x11b   :  { %v1051_v59 = vadd.f32 %v1050_v55, %v1049_v52  ;;  %v412_v60 = vadd.f32 %v1016_v54, %v342_v49 }
 0x11d   :  { %v482_v63 = vadd.f32 %v1051_v59, %v412_v60 }
 0x11f   :  { %908 = vmatmul.mubr.msk.f32.vlgmr.msra.gmra.mrb[4].mxu0 %vm545_vm0, %v482_v63  ;;  %909 = vmatmul.mubr.msk.f32.vlgmr.msra.gmra.mrb[4].mxu1 %vm545_vm0, %v482_v63  ;;  %486 = vst.msk [vmem:[#allocation4] sm:$0x3] %vm485_vm1, %v482_v63 }
 0x120   :  { %1191 = vmatpush1.bf16.msra.mxu0 %v1190_v61  ;;  %1195 = vmatpush1.bf16.msra.mxu1 %v1194_v62 }
 0x121   :  { %755 = vmatprep.mubr.f32.mxu0 %v1251_v39  ;;  %826 = vmatprep.mubr.f32.mxu1 %v1251_v39 }
 0x123   :  { %910 = vmatmul.mubr.msk.f32.vlgmr.msra.gmra.mrb[6].mxu0 %vm545_vm0, %v482_v63  ;;  %911 = vmatmul.mubr.msk.f32.vlgmr.msra.gmra.mrb[6].mxu1 %vm545_vm0, %v482_v63 }
 0x124   :  { %1213 = shalt.err (!%p1210_p4)
}
 0x125   :  { %s1214_s24 = scalar_lea.hbm %s1789_s6, 32 }
 0x126   :  { %p1215_p5 = scmp.ne.s32.totalorder %s1789_s6, %s1214_s24  ;;  %p1218_p6 = scmp.lt.u32.totalorder %s1214_s24, %s1789_s6 }
 0x128   :  { %p1220_p7 = pnand %p1218_p6, %p1215_p5 }
 0x12a   :  { %1223 = shalt.err (!%p1220_p7)
}
 0x12b   :  { %898 = dma.vmem_to_hbm [thread:$0]  %s896_s21, 32, %s1789_s6, [#allocation5]   ;;  %v507_v1 = vsub.s32 0, %v1415_v0  ;;  %v515_v2 = vsub.s32 2, %v1415_v0  ;;  %v503_v3 = vld [vmem:[%s1787_s4] sm:$0xff]  ;;  %v511_v4 = vsub.s32 1, %v1415_v0 }
 0x12c   :  { %v519_v5 = vsub.s32 3, %v1415_v0  ;;  %v523_v8 = vsub.s32 4, %v1415_v0  ;;  %v531_v9 = vsub.s32 6, %v1415_v0  ;;  %v527_v12 = vsub.s32 5, %v1415_v0  ;;  %s1253_s4 = smov [#allocation2]  }
 0x12d   :  { %v508_v6 = vrot.slane %v503_v3, %v507_v1  ;;  %v516_v7 = vrot.slane %v503_v3, %v515_v2  ;;  %v512_v10 = vrot.slane %v503_v3, %v511_v4  ;;  %v535_v14 = vsub.s32 7, %v1415_v0  ;;  %s885_s6 = sshll.u32 %s1253_s4, 4  ;;  %s886_s6 = int_to_ptr.vmem [resolvable:$true] %s885_s6 }
 0x12e   :  { %v520_v11 = vrot.slane %v503_v3, %v519_v5  ;;  %v524_v21 = vrot.slane %v503_v3, %v523_v8  ;;  %v532_v22 = vrot.slane %v503_v3, %v531_v9  ;;  %v528_v25 = vrot.slane %v503_v3, %v527_v12  ;;  %s1224_s9 = scalar_lea.vmem %s886_s6, 256  ;;  %p1229_p9 = scmp.lt.s32.totalorder %s886_s6, %s886_s6 }
 0x12f   :  { %v536_v26 = vrot.slane %v503_v3, %v535_v14  ;;  %p1225_p8 = scmp.ne.s32.totalorder %s886_s6, %s1224_s9  ;;  %p1230_p10 = scmp.lt.s32.totalorder %s1224_s9, %s1224_s9 }
 0x131   :  { %p1231_p11 = por %p1230_p10, %p1229_p9 }
 0x133   :  { %p1232_p12 = pnand %p1231_p11, %p1225_p8 }
 0x1f2   :  { %v615_v15 = vpop.f32.mrb[4].mxu0  ;;  %v686_v16 = vpop.f32.mrb[4].mxu1 }
 0x1f3   :  { %v616_v17 = vadd.f32 %v615_v15, %v508_v6  ;;  %v687_v18 = vadd.f32 %v686_v16, %v516_v7  ;;  %v617_v19 = vpop.f32.mrb[5].mxu0  ;;  %v688_v20 = vpop.f32.mrb[5].mxu1 }
 0x1f4   :  { %v618_v23 = vadd.f32 %v617_v19, %v512_v10  ;;  %v689_v24 = vadd.f32 %v688_v20, %v520_v11 }
 0x1f6   :  { %v841_v27 = vcombine.low %v616_v17, %v618_v23  ;;  %v842_v28 = vcombine.low %v687_v18, %v689_v24  ;;  %v757_v29 = vpop.f32.mrb[6].mxu0  ;;  %v828_v30 = vpop.f32.mrb[6].mxu1 }
 0x1f7   :  { %v758_v31 = vadd.f32 %v757_v29, %v524_v21  ;;  %v829_v32 = vadd.f32 %v828_v30, %v532_v22  ;;  %v759_v33 = vpop.f32.mrb[7].mxu0  ;;  %v830_v0 = vpop.f32.mrb[7].mxu1 }
 0x1f8   :  { %v760_v34 = vadd.f32 %v759_v33, %v528_v25  ;;  %v831_v35 = vadd.f32 %v830_v0, %v536_v26  ;;  %v849_v36 = vrot.slane %v841_v27, %v1442_v13  ;;  %v856_v37 = vrot.slane %v842_v28, %v1442_v13 }
 0x1fa   :  { %v858_v38 = vcombine.low %v758_v31, %v760_v34  ;;  %v859_v39 = vcombine.low %v829_v32, %v831_v35  ;;  %v857_v40 = vcombine.low %v849_v36, %v856_v37 }
 0x1fc   :  { %v866_v41 = vrot.slane %v858_v38, %v1442_v13  ;;  %v873_v42 = vrot.slane %v859_v39, %v1442_v13  ;;  %877 = vst [vmem:[#allocation2] sm:$0xff] %v857_v40 }
 0x1fe   :  { %v874_v43 = vcombine.low %v866_v41, %v873_v42 }
 0x200   :  { %878 = vst [vmem:[#allocation2 + $0x8] sm:$0xff] %v874_v43 }
 0x201   :  { %1235 = shalt.err (!%p1232_p12)
}
 0x202   :  { %s1236_s12 = scalar_lea.hbm %s1788_s5, 256 }
 0x203   :  { %p1237_p13 = scmp.ne.s32.totalorder %s1788_s5, %s1236_s12  ;;  %p1240_p0 = scmp.lt.u32.totalorder %s1236_s12, %s1788_s5 }
 0x205   :  { %p1242_p1 = pnand %p1240_p0, %p1237_p13 }
 0x207   :  { %1245 = shalt.err (!%p1242_p1)
}
 0x208   :  { %888 = dma.vmem_to_hbm [thread:$0]  %s886_s6, 256, %s1788_s5, [#allocation3]  }
 0x209   :  { %1246 = dma.done.wait [#allocation3], 256  }
 0x20a   :  { %1247 = vsyncadd [#allocation3], 4294967040 }
 0x20b   :  { %1248 = dma.done.wait [#allocation5], 32  }
 0x20c   :  { %1249 = vsyncadd [#allocation5], 4294967264 }
 0x20d   :  { %905 = vsyncpa [#allocation3], 1 }
 0x20e   :  { %906 = vsyncpa [#allocation5], 1 }

</bundles_post_ra>
